<compile_context>
chip_gen: v7x
topology: tpu7x:2x2x1
jax: 0.10.0
libtpu: 0.0.40
codegen_flags: <defaults>
</compile_context>

<pallas_src>
import functools

import jax
import jax.numpy as jnp
from jax.experimental import pallas as pl
from jax.experimental.pallas import tpu as pltpu

_LANE = 128
_MIN_BLOCKS = 8                    # >= 4 grid steps per v7x TensorCore
_TARGET_TILE_BYTES = 8 << 20       # ~8 MiB per tile (per review, v7x-sized)
_VMEM_LIMIT_BYTES = 48 << 20       # fits 2 arrays x 2 buffers + scratch on all gens


def _custom_sigmoid_kernel(x_ref, o_ref, *, rng, steep):
    # Compute in f32 for every input dtype (v5e has no bf16 VPU/EUP; the
    # converts are free under DMA on a memory-bound kernel).
    x = x_ref[...].astype(jnp.float32)
    # 2r/(1+exp(-s*x)) - r with the heavy math on the EUP:
    #   exp            -> EUP transcendental
    #   reciprocal     -> EUP approx (vrcp)
    #   + one Newton-Raphson step (3 cheap VPU ops/elem) to recover ~f32
    #     precision, so total VALU work stays well under the per-tile DMA
    #     window even on v7x @ 3.2 TB/s.
    d = 1.0 + jnp.exp(x * (-steep))
    r0 = pl.reciprocal(d, approx=True)
    r = r0 * (2.0 - d * r0)                     # one NR refinement
    y = (2.0 * rng) * r - rng
    o_ref[...] = y.astype(o_ref.dtype)


def custom_sigmoid(x, range_=80.0, steep=0.02, *,
                   target_tile_bytes=_TARGET_TILE_BYTES,
                   in_place=False):
    """Applies CustomSigmoid elementwise via a Pallas TPU kernel.

    in_place=True adds input_output_aliases={0: 0}; only use it when the
    caller donates `x` (otherwise XLA inserts a defensive copy).
    """
    orig_shape = x.shape
    dtype = x.dtype
    n = x.size
    itemsize = jnp.dtype(dtype).itemsize
    rng = float(range_)
    stp = float(steep)
    # Packed sublane multiple: 8 (f32), 16 (bf16), 32 (int8/fp8).
    sub = max(8, 32 // max(itemsize, 1))

    # Tiny tensors: a grid=(1,) pallas_call launch is pure overhead; let XLA
    # fuse the few-vreg math instead.
    if n < sub * _LANE:
        xf = x.astype(jnp.float32)
        return (2.0 * rng / (1.0 + jnp.exp(-xf * stp)) - rng).astype(dtype)

    # ---- lane-dense layout (rows, W), W a wide multiple of 128 ----------
    W = 0
    for w in (4096, 2048, 1024, 512, 256, 128):
        if n % w == 0:
            W = w
            break
    if W:
        rows = n // W
        x2d = jnp.reshape(x, (rows, W))          # free contiguous reshape
        padded = False
    else:
        # Rare ragged case (n not a multiple of 128): pad the flat tail once.
        # TODO(synk): handle with a masked 1-D tail block instead of a pad copy.
        W = _LANE
        rows = pl.cdiv(n, W)
        x2d = jnp.pad(jnp.ravel(x), (0, rows * W - n)).reshape(rows, W)
        padded = True

    # ---- block_rows: big (8,128)-legal tiles, non-divisible grid OK ------
    if rows <= sub:
        block_rows = rows            # full-dim block is always layout-legal
    else:
        max_rows = max(sub, (target_tile_bytes // (W * itemsize)) // sub * sub)
        want = min(max_rows, pl.cdiv(rows, _MIN_BLOCKS))
        block_rows = max(sub, (want // sub) * sub)
    grid = (pl.cdiv(rows, block_rows),)          # partial last block is masked

    kernel = functools.partial(_custom_sigmoid_kernel, rng=rng, steep=stp)

    call_kwargs = {}
    if in_place:
        call_kwargs["input_output_aliases"] = {0: 0}

    out2d = pl.pallas_call(
        kernel,
        out_shape=jax.ShapeDtypeStruct((rows, W), dtype),
        grid_spec=pltpu.PrefetchScalarGridSpec(
            num_scalar_prefetch=0,
            grid=grid,
            in_specs=[pl.BlockSpec((block_rows, W), lambda i: (i, 0))],
            out_specs=pl.BlockSpec((block_rows, W), lambda i: (i, 0)),
        ),
        compiler_params=pltpu.CompilerParams(
            dimension_semantics=("parallel",),
            vmem_limit_bytes=_VMEM_LIMIT_BYTES,
        ),
        **call_kwargs,
    )(x2d)

    if padded:
        return out2d.reshape(-1)[:n].reshape(orig_shape)
    return out2d.reshape(orig_shape)


if __name__ == "__main__":
    def ref_fn(x, r=80.0, s=0.02):
        xf = x.astype(jnp.float32)
        return 2.0 * r / (1.0 + jnp.exp(-xf * s)) - r

    key = jax.random.PRNGKey(0)
    k1, k2, k3, k4 = jax.random.split(key, 4)

    # Small NCHW activation tensor (single block, grid=(1,)).
    x1 = jax.random.normal(k1, (2, 4, 16, 16), dtype=jnp.float32) * 50.0
    o1 = jax.block_until_ready(custom_sigmoid(x1, range_=80.0, steep=0.02))
    assert o1.shape == x1.shape and o1.dtype == x1.dtype
    assert jnp.allclose(o1, ref_fn(x1), atol=2e-3, rtol=1e-4)

    # Multi-block path (grid > 1, all blocks full).
    x2 = jax.random.normal(k2, (8, 8, 32, 32), dtype=jnp.float32) * 50.0
    o2 = jax.block_until_ready(custom_sigmoid(x2, range_=80.0, steep=0.02))
    assert jnp.allclose(o2, ref_fn(x2), atol=2e-3, rtol=1e-4)

    # Ragged row count -> non-divisible grid with a masked partial last block.
    x3 = jax.random.normal(k3, (3, 5, 16, 16), dtype=jnp.float32) * 50.0
    o3 = jax.block_until_ready(custom_sigmoid(x3, range_=80.0, steep=0.02))
    assert o3.shape == x3.shape
    assert jnp.allclose(o3, ref_fn(x3), atol=2e-3, rtol=1e-4)

    # bf16 activations: packed-sublane block sizing, f32 compute, bf16 store.
    x4 = (jax.random.normal(k4, (4, 16, 32, 32), dtype=jnp.float32)
          * 50.0).astype(jnp.bfloat16)
    o4 = jax.block_until_ready(custom_sigmoid(x4, range_=80.0, steep=0.02))
    assert o4.dtype == jnp.bfloat16
    assert jnp.allclose(o4.astype(jnp.float32), ref_fn(x4), atol=0.5, rtol=2e-2)

    print("KERNEL_OK")
</pallas_src>

<mosaic_0001>
module attributes {stable_mosaic.version = 11 : i64} {
  func.func @_custom_sigmoid_kernel(%arg0: i32, %arg1: memref<1x2048xf32, #tpu.memory_space<vmem>>, %arg2: memref<1x2048xf32, #tpu.memory_space<vmem>>) attributes {dimension_semantics = [#tpu.dimension_semantics<parallel>], iteration_bounds = array<i64: 1>, scalar_prefetch = 0 : i64, scratch_operands = 0 : i64, tpu.core_type = #tpu.core_type<tc>, window_params = [{transform_indices = @transform_0, window_bounds = array<i64: 1, 2048>}, {transform_indices = @transform_1, window_bounds = array<i64: 1, 2048>}]} {
    %c0 = arith.constant 0 : index
    %c0_0 = arith.constant 0 : index
    %0 = vector.load %arg1[%c0, %c0_0] : memref<1x2048xf32, #tpu.memory_space<vmem>>, vector<1x2048xf32>
    %cst = arith.constant -2.000000e-02 : f32
    %1 = vector.broadcast %cst : f32 to vector<1x2048xf32>
    %2 = arith.mulf %0, %1 : vector<1x2048xf32>
    %3 = math.exp %2 : vector<1x2048xf32>
    %cst_1 = arith.constant 1.000000e+00 : f32
    %4 = vector.broadcast %cst_1 : f32 to vector<1x2048xf32>
    %5 = arith.addf %4, %3 : vector<1x2048xf32>
    %6 = tpu.reciprocal %5 {approx = true} : vector<1x2048xf32> -> vector<1x2048xf32>
    %7 = arith.mulf %5, %6 : vector<1x2048xf32>
    %cst_2 = arith.constant 2.000000e+00 : f32
    %8 = vector.broadcast %cst_2 : f32 to vector<1x2048xf32>
    %9 = arith.subf %8, %7 : vector<1x2048xf32>
    %10 = arith.mulf %6, %9 : vector<1x2048xf32>
    %cst_3 = arith.constant 1.600000e+02 : f32
    %11 = vector.broadcast %cst_3 : f32 to vector<1x2048xf32>
    %12 = arith.mulf %11, %10 : vector<1x2048xf32>
    %cst_4 = arith.constant 8.000000e+01 : f32
    %13 = vector.broadcast %cst_4 : f32 to vector<1x2048xf32>
    %14 = arith.subf %12, %13 : vector<1x2048xf32>
    %c0_5 = arith.constant 0 : index
    %c0_6 = arith.constant 0 : index
    %15 = vector.load %arg2[%c0_5, %c0_6] : memref<1x2048xf32, #tpu.memory_space<vmem>>, vector<1x2048xf32>
    tpu.vector_store %arg2[%c0_5, %c0_6], %14 {strides = array<i32>} : memref<1x2048xf32, #tpu.memory_space<vmem>>, vector<1x2048xf32>,
    return
  }
  func.func @transform_0(%arg0: i32) -> (i32, i32) {
    %c0_i32 = arith.constant 0 : i32
    %c0_i32_0 = arith.constant 0 : i32
    return %arg0, %c0_i32 : i32, i32
  }
  func.func @transform_1(%arg0: i32) -> (i32, i32) {
    %c0_i32 = arith.constant 0 : i32
    %c0_i32_0 = arith.constant 0 : i32
    return %arg0, %c0_i32 : i32, i32
  }
}

</mosaic_0001>

<bundles_post_ra>
// kernel: tpu_custom_call.1
= control target key start
LH: loop header
LB: loop body
LE: loop exit
PB: predicated region body
PF: predicated region fallthrough
CT: control target
= control target key end

     0   :  { %6 = vsyncpa [#allocation3], 0  ;;  %s156_s0 = inlined_call_operand.hbm [shape: f32[1,2048], index: 0, kind: input, shape index: {}]   ;;  %s157_s1 = inlined_call_operand.hbm [shape: f32[1,2048], index: 1, kind: output, shape index: {}]  }
   0x1   :  { %7 = vsyncpa [#allocation4], 0  ;;  %s120_s6 = smov [#allocation2]   ;;  %s72_s10 = scalar_lea.hbm %s156_s0, 256 }
   0x2   :  { %s14_s7 = sshll.u32 %s120_s6, 4  ;;  %p73_p0 = scmp.ne.s32.totalorder %s156_s0, %s72_s10  ;;  %s15_s7 = int_to_ptr.vmem [resolvable:$true] %s14_s7 }
   0x3   :  { %p76_p1 = scmp.lt.u32.totalorder %s72_s10, %s156_s0 }
   0x5   :  { %p78_p2 = pnand %p76_p1, %p73_p0 }
   0x7   :  { %81 = shalt.err (!%p78_p2)
}
   0x8   :  { %s82_s15 = scalar_lea.vmem %s15_s7, 256  ;;  %p87_p4 = scmp.lt.s32.totalorder %s15_s7, %s15_s7 }
   0x9   :  { %p83_p3 = scmp.ne.s32.totalorder %s15_s7, %s82_s15  ;;  %p88_p5 = scmp.lt.s32.totalorder %s82_s15, %s82_s15 }
   0xb   :  { %p89_p6 = por %p88_p5, %p87_p4 }
   0xd   :  { %p90_p7 = pnand %p89_p6, %p83_p3 }
   0xf   :  { %93 = shalt.err (!%p90_p7)
}
  0x10   :  { %17 = dma.hbm_to_vmem [thread:$0]  %s156_s0, 256, %s15_s7, [#allocation3]  }
  0x11   :  { %116 = dma.done.wait [#allocation3], 256  }
  0x12   :  { %117 = vsyncadd [#allocation3], 4294967040  ;;  %v21_v0 = vld [vmem:[#allocation2] sm:$0xff]  ;;  %v22_v1 = vld [vmem:[#allocation2 + $0x8] sm:$0xff]  ;;  %s121_s0 = smov [#allocation5]  }
  0x13   :  { %v23_v2 = vmul.f32 -0.02, %v21_v0  ;;  %v24_v3 = vmul.f32 -0.02, %v22_v1  ;;  %s51_s18 = sshll.u32 %s121_s0, 4  ;;  %s52_s18 = int_to_ptr.vmem [resolvable:$true] %s51_s18 }
  0x14   :  { %s94_s19 = scalar_lea.vmem %s52_s18, 256  ;;  %p99_p9 = scmp.lt.s32.totalorder %s52_s18, %s52_s18 }
  0x15   :  { %v25_v4 = vmul.f32 1.442695, %v23_v2  ;;  %v27_v5 = vmul.f32 1.442695, %v24_v3  ;;  %p95_p8 = scmp.ne.s32.totalorder %s52_s18, %s94_s19  ;;  %p100_p10 = scmp.lt.s32.totalorder %s94_s19, %s94_s19 }
  0x17   :  { %64 = vpow2.f32 %v25_v4  ;;  %p101_p11 = por %p100_p10, %p99_p9 }
  0x18   :  { %66 = vpow2.f32 %v27_v5 }
  0x19   :  { %p102_p12 = pnand %p101_p11, %p95_p8 }
  0x21   :  { %v65_v6 = vpop.eup %64 }
  0x22   :  { %v67_v7 = vpop.eup %66  ;;  %v29_v8 = vadd.f32 1.0, %v65_v6 }
  0x23   :  { %v30_v9 = vadd.f32 1.0, %v67_v7 }
  0x24   :  { %68 = vrcp.f32 %v29_v8 }
  0x25   :  { %70 = vrcp.f32 %v30_v9 }
  0x2e   :  { %v69_v10 = vpop.eup %68 }
  0x2f   :  { %v71_v11 = vpop.eup %70  ;;  %v33_v12 = vmul.f32 %v69_v10, %v29_v8 }
  0x30   :  { %v34_v13 = vmul.f32 %v71_v11, %v30_v9 }
  0x31   :  { %v35_v14 = vsub.f32 2.0, %v33_v12 }
  0x32   :  { %v36_v15 = vsub.f32 2.0, %v34_v13 }
  0x33   :  { %v37_v16 = vmul.f32 %v69_v10, %v35_v14 }
  0x34   :  { %v38_v17 = vmul.f32 %v71_v11, %v36_v15 }
  0x35   :  { %v39_v18 = vmul.f32 160.0, %v37_v16 }
  0x36   :  { %v40_v19 = vmul.f32 160.0, %v38_v17 }
  0x37   :  { %v60_v20 = vadd.f32 -80.0, %v39_v18 }
  0x38   :  { %v61_v21 = vadd.f32 -80.0, %v40_v19 }
  0x39   :  { %43 = vst [vmem:[#allocation5] sm:$0xff] %v60_v20 }
  0x3a   :  { %44 = vst [vmem:[#allocation5 + $0x8] sm:$0xff] %v61_v21 }
  0x3b   :  { %105 = shalt.err (!%p102_p12)
}
  0x3c   :  { %s106_s22 = scalar_lea.hbm %s157_s1, 256 }
  0x3d   :  { %p107_p13 = scmp.ne.s32.totalorder %s157_s1, %s106_s22  ;;  %p110_p0 = scmp.lt.u32.totalorder %s106_s22, %s157_s1 }
  0x3f   :  { %p112_p1 = pnand %p110_p0, %p107_p13 }
  0x41   :  { %115 = shalt.err (!%p112_p1)
}
  0x42   :  { %54 = dma.vmem_to_hbm [thread:$0]  %s52_s18, 256, %s157_s1, [#allocation4]  }
  0x43   :  { %118 = dma.done.wait [#allocation4], 256  }
  0x44   :  { %119 = vsyncadd [#allocation4], 4294967040 }
  0x45   :  { %58 = vsyncpa [#allocation3], 1 }
  0x46   :  { %59 = vsyncpa [#allocation4], 1 }

</bundles_post_ra>
